<compile_context>
chip_gen: v7x
topology: tpu7x:2x2x1
jax: 0.10.0
libtpu: 0.0.40
codegen_flags: <defaults>
</compile_context>

<pallas_src>
import jax
import jax.numpy as jnp
from jax.experimental import pallas as pl
from jax.experimental.pallas import tpu as pltpu


def _round_up(a, b):
    return (a + b - 1) // b * b


def _pick_tk(kp):
    """kp is a multiple of 128; return a multiple of 128 that divides kp."""
    if kp <= 1024:
        return kp
    for t in (1024, 512, 256, 128):
        if kp % t == 0:
            return t
    return 128


def _pick_tn(np_, m_blocks):
    """np_ is a multiple of 128; prefer 256-wide tiles, but keep >=2 parallel
    grid blocks available when the M grid has only one block (v7x: 2 TCs)."""
    if np_ % 256 == 0:
        if m_blocks >= 2 or np_ // 256 >= 2:
            return 256
    return 128


def _pick_tm(b):
    """Sublane-aligned batch tile; large (<=512) to amortize weight streaming,
    but shrink if the padding waste would exceed ~25% of a tile."""
    m8 = _round_up(b, 8)
    if m8 <= 512:
        return m8
    tm = 512
    while tm > 64 and _round_up(b, tm) - m8 > tm // 4:
        tm //= 2
    return tm


def _deepblock_kernel(x_ref, rw_ref, cw_ref, rb_ref, cb_ref, o_ref,
                      acc_r_ref, acc_c_ref):
    """One (i, j, k) grid step.

    x_ref:     (TM, TK)   activation tile (compute dtype: bf16 or f32)
    rw_ref:    (TK, TN)   R-branch weight tile
    cw_ref:    (TK, TN)   C-branch weight tile
    rb_ref:    (1, TN)    R bias (f32)
    cb_ref:    (1, TN)    C bias (f32)
    o_ref:     (TM, TN)   output tile (lane-dense; TN multiple of 128)
    acc_*_ref: (TM, TN)   f32 accumulators, resident across the K grid axis
    """
    k = pl.program_id(2)

    @pl.when(k == 0)
    def _():
        acc_r_ref[...] = jnp.zeros_like(acc_r_ref)
        acc_c_ref[...] = jnp.zeros_like(acc_c_ref)

    x = x_ref[...]
    acc_r_ref[...] += jnp.dot(x, rw_ref[...], preferred_element_type=jnp.float32)
    acc_c_ref[...] += jnp.dot(x, cw_ref[...], preferred_element_type=jnp.float32)

    @pl.when(k == pl.num_programs(2) - 1)
    def _():
        r = acc_r_ref[...] + rb_ref[...]          # bias added exactly once, in f32
        c = acc_c_ref[...] + cb_ref[...]
        o_ref[...] = (jnp.maximum(r, 0.0) + c).astype(o_ref.dtype)


def prepare_deepblock_params(params, compute_dtype=jnp.bfloat16):
    """One-time preparation (hoisted out of the per-call path):
    pad weights/biases to lane/sublane-aligned shapes and cast weights to the
    compute dtype.  Biases stay f32 (added in the f32 finalize)."""
    rw = params["Rw"]
    rb = params["Rb"]
    k, n = rw.shape

    if n == 1:
        # relu_out == 1: plain linear handled outside Pallas; keep f32 weights.
        return {"linear_only": True, "K": k, "N": n, "Rw": rw, "Rb": rb}

    kp = _round_up(k, 128)
    np_ = _round_up(n, 128)

    def pad_w(w):
        return jnp.pad(w, ((0, kp - k), (0, np_ - n))).astype(compute_dtype)

    def pad_b(b):
        return jnp.pad(b, ((0, 0), (0, np_ - n))).astype(jnp.float32)

    return {
        "linear_only": False,
        "K": k, "N": n, "Kp": kp, "Np": np_,
        "Rw": pad_w(rw), "Cw": pad_w(params["Cw"]),
        "Rb": pad_b(rb), "Cb": pad_b(params["Cb"]),
    }


def deepblock_forward(x, prepared):
    """x: [B, relu_in]. `prepared` comes from prepare_deepblock_params()."""
    B, K = x.shape
    assert K == prepared["K"], "relu_in mismatch"

    if prepared["linear_only"]:
        # relu_out == 1: no ReLU, no C branch. Let XLA's GEMV handle it.
        return (jnp.dot(x, prepared["Rw"], precision=jax.lax.Precision.HIGHEST)
                + prepared["Rb"])

    N, Kp, Np = prepared["N"], prepared["Kp"], prepared["Np"]
    compute_dtype = prepared["Rw"].dtype

    # ---- tile selection: minimal padding, lane/sublane aligned ----
    TM = _pick_tm(B)
    Mp = _round_up(B, TM)
    m_blocks = Mp // TM
    TK = _pick_tk(Kp)
    TN = _pick_tn(Np, m_blocks)

    grid = (Mp // TM, Np // TN, Kp // TK)

    # Only the (small) activation is padded/cast per call; weights were
    # prepared once.
    xp = jnp.pad(x, ((0, Mp - B), (0, Kp - K))).astype(compute_dtype)

    isz = jnp.dtype(compute_dtype).itemsize
    flops = 2 * Mp * Kp * Np * 2                      # two GEMMs (R and C)
    bytes_accessed = (isz * (Mp * Kp + 2 * Kp * Np)
                      + 4 * (2 * Np + Mp * Np))

    out = pl.pallas_call(
        _deepblock_kernel,
        out_shape=jax.ShapeDtypeStruct((Mp, Np), x.dtype),
        grid_spec=pltpu.PrefetchScalarGridSpec(
            num_scalar_prefetch=0,
            grid=grid,
            in_specs=[
                pl.BlockSpec((TM, TK), lambda i, j, k: (i, k)),   # x
                pl.BlockSpec((TK, TN), lambda i, j, k: (k, j)),   # Rw
                pl.BlockSpec((TK, TN), lambda i, j, k: (k, j)),   # Cw
                pl.BlockSpec((1, TN), lambda i, j, k: (0, j)),    # Rb
                pl.BlockSpec((1, TN), lambda i, j, k: (0, j)),    # Cb
            ],
            out_specs=pl.BlockSpec((TM, TN), lambda i, j, k: (i, j)),
            scratch_shapes=[
                pltpu.VMEM((TM, TN), jnp.float32),   # acc for R branch
                pltpu.VMEM((TM, TN), jnp.float32),   # acc for C branch
            ],
        ),
        compiler_params=pltpu.CompilerParams(
            dimension_semantics=("parallel", "parallel", "arbitrary"),
        ),
        cost_estimate=pl.CostEstimate(
            flops=flops, transcendentals=0, bytes_accessed=bytes_accessed
        ),
    )(xp, prepared["Rw"], prepared["Cw"], prepared["Rb"], prepared["Cb"])

    return out[:B, :N]


def init_deepblock_params(key, relu_in, relu_out):
    """Synthetic init mirroring the module: weights ~ U[0,1) (uniform_),
    biases ~ U(-1/sqrt(in), 1/sqrt(in)) (PyTorch Linear default bias init).
    Weights stored transposed as [relu_in, relu_out]; biases as [1, relu_out]."""
    k_rw, k_rb, k_cw, k_cb = jax.random.split(key, 4)
    bound = 1.0 / jnp.sqrt(relu_in)
    params = {
        "Rw": jax.random.uniform(k_rw, (relu_in, relu_out), jnp.float32),
        "Rb": jax.random.uniform(
            k_rb, (1, relu_out), jnp.float32, minval=-bound, maxval=bound
        ),
    }
    if relu_out != 1:
        params["Cw"] = jax.random.uniform(k_cw, (relu_in, relu_out), jnp.float32)
        params["Cb"] = jax.random.uniform(
            k_cb, (1, relu_out), jnp.float32, minval=-bound, maxval=bound
        )
    return params


def deepblock_reference(x, params):
    """Pure-JAX reference of the PyTorch forward (highest-precision dots)."""
    hp = jax.lax.Precision.HIGHEST
    r = jnp.dot(x, params["Rw"], precision=hp) + params["Rb"]
    if params["Rw"].shape[1] == 1:
        return r
    c = jnp.dot(x, params["Cw"], precision=hp) + params["Cb"]
    return jnp.maximum(r, 0.0) + c


if __name__ == "__main__":
    key = jax.random.PRNGKey(0)
    k_x, k_p, k_p1, k_x2, k_p2 = jax.random.split(key, 5)

    # Case 1: small spec-sized case, f32 compute path (tight numerics).
    B, relu_in, relu_out = 8, 32, 16
    x = jax.random.normal(k_x, (B, relu_in), jnp.float32)
    params = init_deepblock_params(k_p, relu_in, relu_out)
    prep_f32 = prepare_deepblock_params(params, compute_dtype=jnp.float32)
    out = jax.block_until_ready(deepblock_forward(x, prep_f32))
    ref = deepblock_reference(x, params)
    assert out.shape == (B, relu_out)
    assert jnp.allclose(out, ref, atol=1e-4, rtol=1e-4), "mismatch (small, f32)"

    # Case 2: exercises padding/tiling (K=600 -> 640, N=260 -> 384, 3 N-blocks).
    B2, in2, out2 = 24, 600, 260
    x2 = jax.random.normal(k_x2, (B2, in2), jnp.float32)
    params2 = init_deepblock_params(k_p2, in2, out2)

    # 2a: f32 compute path, tight tolerance (verifies grid/tiling correctness).
    prep2_f32 = prepare_deepblock_params(params2, compute_dtype=jnp.float32)
    o2 = jax.block_until_ready(deepblock_forward(x2, prep2_f32))
    ref2 = deepblock_reference(x2, params2)
    assert o2.shape == (B2, out2)
    assert jnp.allclose(o2, ref2, atol=1e-3, rtol=1e-3), "mismatch (tiled, f32)"

    # 2b: bf16 compute path (default; native MXU rate, halved HBM bytes).
    # Tolerance is loosened vs. the HIGHEST-precision f32 reference because the
    # inputs are quantized to bf16 before the K~600 reduction.
    prep2_bf16 = prepare_deepblock_params(params2)   # bf16 default
    o2b = jax.block_until_ready(deepblock_forward(x2, prep2_bf16))
    assert o2b.shape == (B2, out2)
    assert jnp.allclose(o2b, ref2, atol=0.5, rtol=2e-2), "mismatch (tiled, bf16)"

    # Case 3: relu_out == 1 degenerate path (plain linear, no ReLU, no C).
    params1 = init_deepblock_params(k_p1, relu_in, 1)
    prep1 = prepare_deepblock_params(params1)
    out1 = jax.block_until_ready(deepblock_forward(x, prep1))
    ref1 = deepblock_reference(x, params1)
    assert out1.shape == (B, 1)
    assert jnp.allclose(out1, ref1, atol=1e-5, rtol=1e-5), "mismatch (relu_out == 1)"

    print("KERNEL_OK")
</pallas_src>

<mosaic_0001>
module attributes {stable_mosaic.version = 11 : i64} {
  func.func @_deepblock_kernel(%arg0: i32, %arg1: i32, %arg2: i32, %arg3: memref<8x128xf32, #tpu.memory_space<vmem>>, %arg4: memref<128x128xf32, #tpu.memory_space<vmem>>, %arg5: memref<128x128xf32, #tpu.memory_space<vmem>>, %arg6: memref<1x128xf32, #tpu.memory_space<vmem>>, %arg7: memref<1x128xf32, #tpu.memory_space<vmem>>, %arg8: memref<8x128xf32, #tpu.memory_space<vmem>>, %arg9: memref<8x128xf32, #tpu.memory_space<vmem>>, %arg10: memref<8x128xf32, #tpu.memory_space<vmem>>) attributes {dimension_semantics = [#tpu.dimension_semantics<parallel>, #tpu.dimension_semantics<parallel>, #tpu.dimension_semantics<arbitrary>], iteration_bounds = array<i64: 1, 1, 1>, scalar_prefetch = 0 : i64, scratch_operands = 2 : i64, tpu.core_type = #tpu.core_type<tc>, window_params = [{transform_indices = @transform_0, window_bounds = array<i64: 8, 128>}, {transform_indices = @transform_1, window_bounds = array<i64: 128, 128>}, {transform_indices = @transform_2, window_bounds = array<i64: 128, 128>}, {transform_indices = @transform_3, window_bounds = array<i64: 1, 128>}, {transform_indices = @transform_4, window_bounds = array<i64: 1, 128>}, {transform_indices = @transform_5, window_bounds = array<i64: 8, 128>}]} {
    %c0_i32 = arith.constant 0 : i32
    %0 = arith.cmpi eq, %arg2, %c0_i32 : i32
    %1 = arith.extui %0 : i1 to i32
    %c0_i32_0 = arith.constant 0 : i32
    %2 = arith.cmpi ne, %1, %c0_i32_0 : i32
    scf.if %2 {
      %cst_17 = arith.constant 0.000000e+00 : f32
      %17 = vector.broadcast %cst_17 : f32 to vector<8x128xf32>
      %c0_18 = arith.constant 0 : index
      %c0_19 = arith.constant 0 : index
      %18 = vector.load %arg9[%c0_18, %c0_19] : memref<8x128xf32, #tpu.memory_space<vmem>>, vector<8x128xf32>
      tpu.vector_store %arg9[%c0_18, %c0_19], %17 {strides = array<i32>} : memref<8x128xf32, #tpu.memory_space<vmem>>, vector<8x128xf32>,
      %cst_20 = arith.constant 0.000000e+00 : f32
      %19 = vector.broadcast %cst_20 : f32 to vector<8x128xf32>
      %c0_21 = arith.constant 0 : index
      %c0_22 = arith.constant 0 : index
      %20 = vector.load %arg10[%c0_21, %c0_22] : memref<8x128xf32, #tpu.memory_space<vmem>>, vector<8x128xf32>
      tpu.vector_store %arg10[%c0_21, %c0_22], %19 {strides = array<i32>} : memref<8x128xf32, #tpu.memory_space<vmem>>, vector<8x128xf32>,
    } else {
    }
    %c0 = arith.constant 0 : index
    %c0_1 = arith.constant 0 : index
    %3 = vector.load %arg3[%c0, %c0_1] : memref<8x128xf32, #tpu.memory_space<vmem>>, vector<8x128xf32>
    %c0_2 = arith.constant 0 : index
    %c0_3 = arith.constant 0 : index
    %4 = vector.load %arg9[%c0_2, %c0_3] : memref<8x128xf32, #tpu.memory_space<vmem>>, vector<8x128xf32>
    %c0_4 = arith.constant 0 : index
    %c0_5 = arith.constant 0 : index
    %5 = vector.load %arg4[%c0_4, %c0_5] : memref<128x128xf32, #tpu.memory_space<vmem>>, vector<128x128xf32>
    %cst = arith.constant dense<0.000000e+00> : vector<8x128xf32>
    %6 = tpu.matmul %3, %5, %cst {dimension_numbers = #tpu.dot_dimension_numbers<[1], [0], [0], [1], [0, 0, 1, 1], [], []>} : vector<8x128xf32>, vector<128x128xf32>, vector<8x128xf32> -> vector<8x128xf32>
    %7 = arith.addf %4, %6 : vector<8x128xf32>
    %c0_6 = arith.constant 0 : index
    %c0_7 = arith.constant 0 : index
    %8 = vector.load %arg9[%c0_6, %c0_7] : memref<8x128xf32, #tpu.memory_space<vmem>>, vector<8x128xf32>
    tpu.vector_store %arg9[%c0_6, %c0_7], %7 {strides = array<i32>} : memref<8x128xf32, #tpu.memory_space<vmem>>, vector<8x128xf32>,
    %c0_8 = arith.constant 0 : index
    %c0_9 = arith.constant 0 : index
    %9 = vector.load %arg10[%c0_8, %c0_9] : memref<8x128xf32, #tpu.memory_space<vmem>>, vector<8x128xf32>
    %c0_10 = arith.constant 0 : index
    %c0_11 = arith.constant 0 : index
    %10 = vector.load %arg5[%c0_10, %c0_11] : memref<128x128xf32, #tpu.memory_space<vmem>>, vector<128x128xf32>
    %cst_12 = arith.constant dense<0.000000e+00> : vector<8x128xf32>
    %11 = tpu.matmul %3, %10, %cst_12 {dimension_numbers = #tpu.dot_dimension_numbers<[1], [0], [0], [1], [0, 0, 1, 1], [], []>} : vector<8x128xf32>, vector<128x128xf32>, vector<8x128xf32> -> vector<8x128xf32>
    %12 = arith.addf %9, %11 : vector<8x128xf32>
    %c0_13 = arith.constant 0 : index
    %c0_14 = arith.constant 0 : index
    %13 = vector.load %arg10[%c0_13, %c0_14] : memref<8x128xf32, #tpu.memory_space<vmem>>, vector<8x128xf32>
    tpu.vector_store %arg10[%c0_13, %c0_14], %12 {strides = array<i32>} : memref<8x128xf32, #tpu.memory_space<vmem>>, vector<8x128xf32>,
    %c0_i32_15 = arith.constant 0 : i32
    %14 = arith.cmpi eq, %arg2, %c0_i32_15 : i32
    %15 = arith.extui %14 : i1 to i32
    %c0_i32_16 = arith.constant 0 : i32
    %16 = arith.cmpi ne, %15, %c0_i32_16 : i32
    scf.if %16 {
      %c0_17 = arith.constant 0 : index
      %c0_18 = arith.constant 0 : index
      %17 = vector.load %arg9[%c0_17, %c0_18] : memref<8x128xf32, #tpu.memory_space<vmem>>, vector<8x128xf32>
      %c0_19 = arith.constant 0 : index
      %c0_20 = arith.constant 0 : index
      %18 = vector.load %arg6[%c0_19, %c0_20] : memref<1x128xf32, #tpu.memory_space<vmem>>, vector<1x128xf32>
      %19 = vector.broadcast %18 : vector<1x128xf32> to vector<8x128xf32>
      %20 = arith.addf %17, %19 : vector<8x128xf32>
      %c0_21 = arith.constant 0 : index
      %c0_22 = arith.constant 0 : index
      %21 = vector.load %arg10[%c0_21, %c0_22] : memref<8x128xf32, #tpu.memory_space<vmem>>, vector<8x128xf32>
      %c0_23 = arith.constant 0 : index
      %c0_24 = arith.constant 0 : index
      %22 = vector.load %arg7[%c0_23, %c0_24] : memref<1x128xf32, #tpu.memory_space<vmem>>, vector<1x128xf32>
      %23 = vector.broadcast %22 : vector<1x128xf32> to vector<8x128xf32>
      %24 = arith.addf %21, %23 : vector<8x128xf32>
      %cst_25 = arith.constant 0.000000e+00 : f32
      %25 = vector.broadcast %cst_25 : f32 to vector<8x128xf32>
      %26 = arith.maximumf %20, %25 : vector<8x128xf32>
      %27 = arith.addf %26, %24 : vector<8x128xf32>
      %c0_26 = arith.constant 0 : index
      %c0_27 = arith.constant 0 : index
      %28 = vector.load %arg8[%c0_26, %c0_27] : memref<8x128xf32, #tpu.memory_space<vmem>>, vector<8x128xf32>
      tpu.vector_store %arg8[%c0_26, %c0_27], %27 {strides = array<i32>} : memref<8x128xf32, #tpu.memory_space<vmem>>, vector<8x128xf32>,
    } else {
    }
    return
  }
  func.func @transform_0(%arg0: i32, %arg1: i32, %arg2: i32) -> (i32, i32) {
    %c0_i32 = arith.constant 0 : i32
    return %arg0, %arg2 : i32, i32
  }
  func.func @transform_1(%arg0: i32, %arg1: i32, %arg2: i32) -> (i32, i32) {
    %c0_i32 = arith.constant 0 : i32
    return %arg2, %arg1 : i32, i32
  }
  func.func @transform_2(%arg0: i32, %arg1: i32, %arg2: i32) -> (i32, i32) {
    %c0_i32 = arith.constant 0 : i32
    return %arg2, %arg1 : i32, i32
  }
  func.func @transform_3(%arg0: i32, %arg1: i32, %arg2: i32) -> (i32, i32) {
    %c0_i32 = arith.constant 0 : i32
    %c0_i32_0 = arith.constant 0 : i32
    return %c0_i32, %arg1 : i32, i32
  }
  func.func @transform_4(%arg0: i32, %arg1: i32, %arg2: i32) -> (i32, i32) {
    %c0_i32 = arith.constant 0 : i32
    %c0_i32_0 = arith.constant 0 : i32
    return %c0_i32, %arg1 : i32, i32
  }
  func.func @transform_5(%arg0: i32, %arg1: i32, %arg2: i32) -> (i32, i32) {
    %c0_i32 = arith.constant 0 : i32
    return %arg0, %arg1 : i32, i32
  }
}

</mosaic_0001>

<bundles_post_ra>
// kernel: tpu_custom_call.1
= control target key start
LH: loop header
LB: loop body
LE: loop exit
PB: predicated region body
PF: predicated region fallthrough
CT: control target
= control target key end

     0   :  { %10 = vsyncpa [#allocation5], 0  ;;  %s657_s0 = inlined_call_operand.hbm [shape: f32[8,128], index: 0, kind: input, shape index: {}]   ;;  %s658_s1 = inlined_call_operand.hbm [shape: f32[128,128], index: 1, kind: input, shape index: {}]   ;;  %s659_s2 = inlined_call_operand.hbm [shape: f32[128,128], index: 2, kind: input, shape index: {}]   ;;  %s660_s3 = inlined_call_operand.vmem [shape: f32[1,128], index: 3, kind: input, shape index: {}]   ;;  %s661_s4 = inlined_call_operand.vmem [shape: f32[1,128], index: 4, kind: input, shape index: {}]   ;;  %s662_s5 = inlined_call_operand.hbm [shape: f32[8,128], index: 5, kind: output, shape index: {}]  }
   0x1   :  { %11 = vsyncpa [#allocation8], 0 }
   0x2   :  { %12 = vsyncpa [#allocation6], 0  ;;  %s542_s18 = smov [#allocation7]   ;;  %s448_s22 = scalar_lea.hbm %s658_s1, 2048 }
   0x3   :  { %s28_s19 = sshll.u32 %s542_s18, 4  ;;  %p449_p0 = scmp.ne.s32.totalorder %s658_s1, %s448_s22  ;;  %s29_s19 = int_to_ptr.vmem [resolvable:$true] %s28_s19 }
   0x4   :  { %p452_p1 = scmp.lt.u32.totalorder %s448_s22, %s658_s1 }
   0x6   :  { %p454_p2 = pnand %p452_p1, %p449_p0 }
   0x8   :  { %457 = shalt.err (!%p454_p2)
}
   0x9   :  { %s458_s27 = scalar_lea.vmem %s29_s19, 2048  ;;  %p463_p4 = scmp.lt.s32.totalorder %s29_s19, %s29_s19 }
   0xa   :  { %p459_p3 = scmp.ne.s32.totalorder %s29_s19, %s458_s27  ;;  %p464_p5 = scmp.lt.s32.totalorder %s458_s27, %s458_s27 }
   0xc   :  { %p465_p6 = por %p464_p5, %p463_p4 }
   0xe   :  { %p466_p7 = pnand %p465_p6, %p459_p3 }
  0x10   :  { %469 = shalt.err (!%p466_p7)
}
  0x11   :  { %s543_s28 = smov 128   ;;  %s544_s29 = smov 8  }
  0x12   :  { %34 = dma.hbm_to_vmem [thread:$0]  %s658_s1, 2048, %s29_s19, [#allocation8], %s543_s28, %s543_s28, %s544_s29  }
  0x13   :  { %s545_s7 = smov [#allocation4]   ;;  %s546_s9 = smov [#allocation9]  }
  0x14   :  { %s19_s8 = sshll.u32 %s545_s7, 4  ;;  %s40_s10 = sshll.u32 %s546_s9, 4  ;;  %s20_s8 = int_to_ptr.vmem [resolvable:$true] %s19_s8  ;;  %s41_s10 = int_to_ptr.vmem [resolvable:$true] %s40_s10 }
  0x15   :  { %s470_s13 = scalar_lea.hbm %s657_s0, 128 }
  0x16   :  { %p471_p8 = scmp.ne.s32.totalorder %s657_s0, %s470_s13  ;;  %p474_p9 = scmp.lt.u32.totalorder %s470_s13, %s657_s0 }
  0x18   :  { %p476_p10 = pnand %p474_p9, %p471_p8 }
  0x1a   :  { %479 = shalt.err (!%p476_p10)
}
  0x1b   :  { %s480_s1 = scalar_lea.vmem %s20_s8, 128  ;;  %p485_p12 = scmp.lt.s32.totalorder %s20_s8, %s20_s8 }
  0x1c   :  { %p481_p11 = scmp.ne.s32.totalorder %s20_s8, %s480_s1  ;;  %p486_p13 = scmp.lt.s32.totalorder %s480_s1, %s480_s1 }
  0x1e   :  { %p487_p0 = por %p486_p13, %p485_p12 }
  0x20   :  { %p488_p1 = pnand %p487_p0, %p481_p11 }
  0x22   :  { %491 = shalt.err (!%p488_p1)
}
  0x23   :  { %22 = dma.hbm_to_vmem [thread:$0]  %s657_s0, 128, %s20_s8, [#allocation5]  }
  0x24   :  { %s492_s22 = scalar_lea.hbm %s659_s2, 2048 }
  0x25   :  { %p493_p2 = scmp.ne.s32.totalorder %s659_s2, %s492_s22  ;;  %p496_p3 = scmp.lt.u32.totalorder %s492_s22, %s659_s2 }
  0x27   :  { %p498_p4 = pnand %p496_p3, %p493_p2 }
  0x29   :  { %501 = shalt.err (!%p498_p4)
}
  0x2a   :  { %s502_s27 = scalar_lea.vmem %s41_s10, 2048  ;;  %p507_p6 = scmp.lt.s32.totalorder %s41_s10, %s41_s10 }
  0x2b   :  { %p503_p5 = scmp.ne.s32.totalorder %s41_s10, %s502_s27  ;;  %p508_p7 = scmp.lt.s32.totalorder %s502_s27, %s502_s27 }
  0x2d   :  { %p509_p8 = por %p508_p7, %p507_p6 }
  0x2f   :  { %p510_p9 = pnand %p509_p8, %p503_p5 }
  0x31   :  { %513 = shalt.err (!%p510_p9)
}
  0x32   :  { %46 = dma.hbm_to_vmem [thread:$0]  %s659_s2, 2048, %s41_s10, [#allocation8], %s543_s28, %s543_s28, %s544_s29  }
  0x33   :  { %536 = dma.done.wait [#allocation5], 128  }
  0x34   :  { %537 = vsyncadd [#allocation5], 4294967168 }
  0x35   :  { %538 = dma.done.wait [#allocation8], 4096  }
  0x36   :  { %539 = vsyncadd [#allocation8], 4294963200  ;;  %v547_v0 = vmov 0.0|0.0   ;;  %vm548_vm0 = vmmov 0   ;;  %v549_v1 = vmov 0.0   ;;  %v68_v2 = vld [vmem:[#allocation7] sm:$0xff] }
  0x37   :  { %391 = vmatprep.subr.bf16.mxu0 %v547_v0  ;;  %415 = vmatprep.subr.bf16.mxu1 %v547_v0  ;;  %v69_v3 = vld [vmem:[#allocation7 + $0x8] sm:$0xff]  ;;  %v157_v4 = vld [vmem:[#allocation9] sm:$0xff]  ;;  %v70_v7 = vld [vmem:[#allocation7 + $0x10] sm:$0xff]  ;;  %s550_s7 = smov [#allocation10]  }
  0x38   :  { %353 = vmatprep.mubr.msk.f32.mxu0 %vm548_vm0, %v549_v1  ;;  %388 = vmatprep.mubr.msk.f32.mxu1 %vm548_vm0, %v549_v1  ;;  %v392_v5 = vpack.c.bf16 %v69_v3, %v68_v2  ;;  %v158_v6 = vld [vmem:[#allocation9 + $0x8] sm:$0xff]  ;;  %v71_v8 = vld [vmem:[#allocation7 + $0x18] sm:$0xff]  ;;  %v159_v10 = vld [vmem:[#allocation9 + $0x10] sm:$0xff]  ;;  %s275_s8 = sshll.u32 %s550_s7, 4  ;;  %s276_s8 = int_to_ptr.vmem [resolvable:$true] %s275_s8 }
  0x39   :  { %v416_v9 = vpack.c.bf16 %v158_v6, %v157_v4  ;;  %v160_v11 = vld [vmem:[#allocation9 + $0x18] sm:$0xff]  ;;  %v395_v12 = vpack.c.bf16 %v71_v8, %v70_v7  ;;  %v72_v14 = vld [vmem:[#allocation7 + $0x20] sm:$0xff]  ;;  %v73_v15 = vld [vmem:[#allocation7 + $0x28] sm:$0xff]  ;;  %s514_s9 = scalar_lea.vmem %s276_s8, 128  ;;  %p519_p11 = scmp.lt.s32.totalorder %s276_s8, %s276_s8 }
  0x3a   :  { %393 = vmatpush3.bf16.msra.mxu0 %v392_v5  ;;  %v419_v13 = vpack.c.bf16 %v160_v11, %v159_v10  ;;  %v161_v16 = vld [vmem:[#allocation9 + $0x20] sm:$0xff]  ;;  %v162_v17 = vld [vmem:[#allocation9 + $0x28] sm:$0xff]  ;;  %v398_v18 = vpack.c.bf16 %v73_v15, %v72_v14  ;;  %v74_v20 = vld [vmem:[#allocation7 + $0x30] sm:$0xff]  ;;  %p515_p10 = scmp.ne.s32.totalorder %s276_s8, %s514_s9  ;;  %p520_p12 = scmp.lt.s32.totalorder %s514_s9, %s514_s9 }
  0x3b   :  { %417 = vmatpush3.bf16.msra.mxu1 %v416_v9  ;;  %394 = vmatprep.subr.bf16.mxu0 %v547_v0  ;;  %v422_v19 = vpack.c.bf16 %v162_v17, %v161_v16  ;;  %v75_v21 = vld [vmem:[#allocation7 + $0x38] sm:$0xff]  ;;  %v163_v22 = vld [vmem:[#allocation9 + $0x30] sm:$0xff]  ;;  %v76_v26 = vld [vmem:[#allocation7 + $0x40] sm:$0xff] }
  0x3c   :  { %418 = vmatprep.subr.bf16.mxu1 %v547_v0  ;;  %v164_v23 = vld [vmem:[#allocation9 + $0x38] sm:$0xff]  ;;  %v401_v24 = vpack.c.bf16 %v75_v21, %v74_v20  ;;  %v77_v27 = vld [vmem:[#allocation7 + $0x48] sm:$0xff]  ;;  %v165_v28 = vld [vmem:[#allocation9 + $0x40] sm:$0xff]  ;;  %p521_p13 = por %p520_p12, %p519_p11 }
  0x3d   :  { %v425_v25 = vpack.c.bf16 %v164_v23, %v163_v22  ;;  %v166_v29 = vld [vmem:[#allocation9 + $0x48] sm:$0xff]  ;;  %v404_v30 = vpack.c.bf16 %v77_v27, %v76_v26  ;;  %v78_v32 = vld [vmem:[#allocation7 + $0x50] sm:$0xff]  ;;  %v79_v33 = vld [vmem:[#allocation7 + $0x58] sm:$0xff] }
  0x3e   :  { %396 = vmatpush3.bf16.msra.mxu0 %v395_v12  ;;  %v428_v31 = vpack.c.bf16 %v166_v29, %v165_v28  ;;  %v167_v34 = vld [vmem:[#allocation9 + $0x50] sm:$0xff]  ;;  %v168_v35 = vld [vmem:[#allocation9 + $0x58] sm:$0xff]  ;;  %v407_v36 = vpack.c.bf16 %v79_v33, %v78_v32  ;;  %v80_v38 = vld [vmem:[#allocation7 + $0x60] sm:$0xff]  ;;  %p522_p0 = pnand %p521_p13, %p515_p10 }
  0x3f   :  { %420 = vmatpush3.bf16.msra.mxu1 %v419_v13  ;;  %397 = vmatprep.subr.bf16.mxu0 %v547_v0  ;;  %v431_v37 = vpack.c.bf16 %v168_v35, %v167_v34  ;;  %v81_v39 = vld [vmem:[#allocation7 + $0x68] sm:$0xff]  ;;  %v169_v40 = vld [vmem:[#allocation9 + $0x60] sm:$0xff]  ;;  %v82_v44 = vld [vmem:[#allocation7 + $0x70] sm:$0xff] }
  0x40   :  { %421 = vmatprep.subr.bf16.mxu1 %v547_v0  ;;  %v170_v41 = vld [vmem:[#allocation9 + $0x68] sm:$0xff]  ;;  %v410_v42 = vpack.c.bf16 %v81_v39, %v80_v38  ;;  %v83_v45 = vld [vmem:[#allocation7 + $0x78] sm:$0xff]  ;;  %v171_v46 = vld [vmem:[#allocation9 + $0x70] sm:$0xff] }
  0x41   :  { %v434_v43 = vpack.c.bf16 %v170_v41, %v169_v40  ;;  %v172_v47 = vld [vmem:[#allocation9 + $0x78] sm:$0xff]  ;;  %v413_v48 = vpack.c.bf16 %v83_v45, %v82_v44 }
  0x42   :  { %399 = vmatpush3.bf16.msra.mxu0 %v398_v18  ;;  %v437_v49 = vpack.c.bf16 %v172_v47, %v171_v46  ;;  %v66_v50 = vld [vmem:[#allocation4] sm:$0xff] }
  0x43   :  { %423 = vmatpush3.bf16.msra.mxu1 %v422_v19  ;;  %400 = vmatprep.subr.bf16.mxu0 %v547_v0  ;;  %v285_v51 = vld [vmem:[%s660_s3] ss:$0 sm:$0xff] }
  0x44   :  { %424 = vmatprep.subr.bf16.mxu1 %v547_v0  ;;  %v286_v52 = vld [vmem:[%s661_s4] ss:$0 sm:$0xff] }
  0x46   :  { %402 = vmatpush3.bf16.msra.mxu0 %v401_v24 }
  0x47   :  { %426 = vmatpush3.bf16.msra.mxu1 %v425_v25  ;;  %403 = vmatprep.subr.bf16.mxu0 %v547_v0 }
  0x48   :  { %427 = vmatprep.subr.bf16.mxu1 %v547_v0 }
  0x4a   :  { %405 = vmatpush3.bf16.msra.mxu0 %v404_v30 }
  0x4b   :  { %429 = vmatpush3.bf16.msra.mxu1 %v428_v31  ;;  %406 = vmatprep.subr.bf16.mxu0 %v547_v0 }
  0x4c   :  { %430 = vmatprep.subr.bf16.mxu1 %v547_v0 }
  0x4e   :  { %408 = vmatpush3.bf16.msra.mxu0 %v407_v36 }
  0x4f   :  { %432 = vmatpush3.bf16.msra.mxu1 %v431_v37  ;;  %409 = vmatprep.subr.bf16.mxu0 %v547_v0 }
  0x50   :  { %433 = vmatprep.subr.bf16.mxu1 %v547_v0 }
  0x52   :  { %411 = vmatpush3.bf16.msra.mxu0 %v410_v42 }
  0x53   :  { %435 = vmatpush3.bf16.msra.mxu1 %v434_v43  ;;  %412 = vmatprep.subr.bf16.mxu0 %v547_v0 }
  0x54   :  { %436 = vmatprep.subr.bf16.mxu1 %v547_v0 }
  0x56   :  { %414 = vmatpush3.bf16.msra.mxu0 %v413_v48 }
  0x57   :  { %438 = vmatpush3.bf16.msra.mxu1 %v437_v49 }
  0x59   :  { %354 = vmatmul.mubr.f32.vlgmr.msra.gmra.mrb[0].mxu0 %v66_v50 }
  0x5a   :  { %389 = vmatmul.mubr.f32.vlgmr.msra.gmra.mrb[0].mxu1 %v66_v50 }
 0x12c   :  { %v150_v53 = vpop.f32.mrb[0].mxu0 }
 0x12d   :  { %v256_v54 = vadd.f32 %v285_v51, %v150_v53  ;;  %v355_v55 = vpop.f32.mrb[1].mxu0  ;;  %v239_v56 = vpop.f32.mrb[0].mxu1 }
 0x12e   :  { %v265_v57 = vadd.f32 %v286_v52, %v239_v56  ;;  %v390_v58 = vpop.f32.mrb[1].mxu1 }
 0x12f   :  { %v266_v59 = vmax.f32 %v256_v54, 0.0 }
 0x131   :  { %v267_v60 = vadd.f32 %v266_v59, %v265_v57 }
 0x133   :  { %268 = vst [vmem:[#allocation10] sm:$0xff] %v267_v60 }
 0x134   :  { %525 = shalt.err (!%p522_p0)
}
 0x135   :  { %s526_s10 = scalar_lea.hbm %s662_s5, 128 }
 0x136   :  { %p527_p1 = scmp.ne.s32.totalorder %s662_s5, %s526_s10  ;;  %p530_p2 = scmp.lt.u32.totalorder %s526_s10, %s662_s5 }
 0x138   :  { %p532_p3 = pnand %p530_p2, %p527_p1 }
 0x13a   :  { %535 = shalt.err (!%p532_p3)
}
 0x13b   :  { %278 = dma.vmem_to_hbm [thread:$0]  %s276_s8, 128, %s662_s5, [#allocation6]  }
 0x13c   :  { %540 = dma.done.wait [#allocation6], 128  }
 0x13d   :  { %541 = vsyncadd [#allocation6], 4294967168 }
 0x13e   :  { %282 = vsyncpa [#allocation5], 1 }
 0x13f   :  { %283 = vsyncpa [#allocation8], 1 }
 0x140   :  { %284 = vsyncpa [#allocation6], 1 }

</bundles_post_ra>
